<compile_context>
chip_gen: v5e
topology: v5e:2x2
jax: 0.10.0
libtpu: 0.0.40
codegen_flags: <defaults>
</compile_context>

<pallas_src>
import math
import jax
import jax.numpy as jnp
from jax.experimental import pallas as pl
from jax.experimental.pallas import tpu as pltpu


def _round_up(x, m):
    return ((x + m - 1) // m) * m


_VMEM_BUDGET = 40 * 1024 * 1024   # resident-activation plan must fit under this
_VMEM_LIMIT = 48 * 1024 * 1024    # <= ~48 MiB so the same plan is safe on v7x (64 MiB)


# ---------------------------------------------------------------------------
# Kernels: pure output projection (LayerNorm already applied in the wrapper).
# Grid = (vocab tile j [OUTER], row tile i [inner])  ->  weight streams once.
# ---------------------------------------------------------------------------

def _proj_kernel_resident(x_ref,    # (M_pad, D) bf16  whole activation, VMEM-resident
                          w_ref,    # (D, TN)    bf16  weight tile
                          b_ref,    # (1, TN)    f32   bias tile
                          o_ref):   # (TM, TN)         logits tile
    tm = o_ref.shape[0]
    row0 = pl.multiple_of(pl.program_id(1) * tm, tm)
    y = x_ref[pl.ds(row0, tm), :]
    o_ref[...] = (jnp.dot(y, w_ref[...], preferred_element_type=jnp.float32)
                  + b_ref[...]).astype(o_ref.dtype)


def _proj_kernel_tiled(x_ref,       # (TM, D) bf16  activation row tile
                       w_ref, b_ref, o_ref):
    o_ref[...] = (jnp.dot(x_ref[...], w_ref[...], preferred_element_type=jnp.float32)
                  + b_ref[...]).astype(o_ref.dtype)


# ---------------------------------------------------------------------------
# Wrapper
# ---------------------------------------------------------------------------

def base_decoder_forward(params, hs_pad, hlens, ys_in_pad, ys_in_lens,
                         out_dtype=jnp.float32):
    """Returns (logits (B, T, V) out_dtype, olens (B, T) int32)."""
    B, T = ys_in_pad.shape
    V = params["vocab_size"]          # static python int
    TN = params["vocab_tile"]         # static python int; weight pre-padded to it
    D = params["emb_table"].shape[1]
    w = params["out_w_bf16"]          # (D, V_pad) bf16, pre-cast + pre-padded
    bias = params["out_b_pad"]        # (1, V_pad) f32,  pre-padded
    V_pad = w.shape[1]

    # hs_pad / hlens (memory / memory_mask) never influence the outputs because
    # BaseDecoder sets self.decoders = None; accepted for API fidelity only.

    # --- Embedding + PositionalEncoding + after_norm LayerNorm (eps=1e-12) -------
    # Done in the wrapper: XLA fuses gather + pos-enc + LN into one producer of the
    # activation slab; f32 statistics preserved, then streamed to the kernel as bf16.
    # TODO(synk): fuse the embedding-row gather into the kernel via a manual DMA
    # gather on an ANY-space table to avoid the (B*T, D) HBM round-trip.
    x = (jnp.take(params["emb_table"], ys_in_pad, axis=0)
         * jnp.float32(math.sqrt(D))
         + params["pe"][None, :T, :]).astype(jnp.float32)
    mean = jnp.mean(x, axis=-1, keepdims=True)
    var = jnp.mean(jnp.square(x - mean), axis=-1, keepdims=True)
    y = (x - mean) * jax.lax.rsqrt(var + 1e-12)
    y = y * params["ln_gamma"] + params["ln_beta"]
    y = y.astype(jnp.bfloat16).reshape(B * T, D)

    # --- Row tiling ---------------------------------------------------------------
    M = B * T
    TM = min(256, _round_up(M, 16))      # 16-row bf16 packing; 256 = full MXU pass
    M_pad = _round_up(M, TM)
    if M_pad != M:
        y = jnp.pad(y, ((0, M_pad - M), (0, 0)))   # zero rows -> bias-only logits, sliced off

    out_itemsize = jnp.dtype(out_dtype).itemsize
    resident_bytes = (2 * M_pad * D * 2              # resident activation (2 pipeline bufs)
                      + 2 * D * TN * 2               # weight tile
                      + 2 * TM * TN * out_itemsize   # output tile
                      + 2 * TN * 4)                  # bias tile
    use_resident = resident_bytes <= _VMEM_BUDGET

    grid = (V_pad // TN, M_pad // TM)    # vocab OUTER -> weight streams exactly once

    if use_resident:
        kernel = _proj_kernel_resident
        x_spec = pl.BlockSpec((M_pad, D), lambda j, i: (0, 0))   # fetched once, VMEM-resident
    else:
        kernel = _proj_kernel_tiled
        x_spec = pl.BlockSpec((TM, D), lambda j, i: (i, 0))      # activation re-streams per j

    grid_spec = pltpu.PrefetchScalarGridSpec(
        num_scalar_prefetch=0,
        grid=grid,
        in_specs=[
            x_spec,
            pl.BlockSpec((D, TN), lambda j, i: (0, j)),   # weight: changes on outer j only
            pl.BlockSpec((1, TN), lambda j, i: (0, j)),   # bias
        ],
        out_specs=pl.BlockSpec((TM, TN), lambda j, i: (i, j)),
    )

    logits_pad = pl.pallas_call(
        kernel,
        out_shape=jax.ShapeDtypeStruct((M_pad, V_pad), out_dtype),
        grid_spec=grid_spec,
        compiler_params=pltpu.CompilerParams(
            dimension_semantics=("parallel", "parallel"),
            vmem_limit_bytes=_VMEM_LIMIT,
        ),
    )(y, w, bias)

    logits = logits_pad[:M, :V].reshape(B, T, V)

    # olens = tgt_mask.sum(1); closed form of the pad-mask & subsequent-mask column
    # sum:  olens[b, t] = (T - t) if t < ys_in_lens[b] else 0.
    t_idx = jnp.arange(T, dtype=jnp.int32)
    olens = jnp.where(t_idx[None, :] < ys_in_lens[:, None].astype(jnp.int32),
                      (T - t_idx)[None, :], 0).astype(jnp.int32)
    return logits, olens


# ---------------------------------------------------------------------------
# Parameters
# ---------------------------------------------------------------------------

def make_params(key, vocab_size, attention_dim, max_len, max_vocab_tile=2048):
    k_emb, k_w, k_b = jax.random.split(key, 3)
    # wenet PositionalEncoding table
    pos = jnp.arange(max_len, dtype=jnp.float32)[:, None]
    div = jnp.exp(jnp.arange(0, attention_dim, 2, dtype=jnp.float32)
                  * -(math.log(10000.0) / attention_dim))
    pe = jnp.zeros((max_len, attention_dim), jnp.float32)
    pe = pe.at[:, 0::2].set(jnp.sin(pos * div))
    pe = pe.at[:, 1::2].set(jnp.cos(pos * div))

    out_w = (jax.random.normal(k_w, (attention_dim, vocab_size), jnp.float32)
             * (1.0 / math.sqrt(attention_dim)))
    out_b = jax.random.normal(k_b, (1, vocab_size), jnp.float32) * 0.01

    # Kernel-facing weight/bias: cast to bf16 and pad the vocab axis to a multiple of
    # the lane tile ONCE here instead of on every forward call.
    vocab_tile = min(max_vocab_tile, _round_up(vocab_size, 256))
    v_pad = _round_up(vocab_size, vocab_tile)
    out_w_bf16 = jnp.pad(out_w.astype(jnp.bfloat16),
                         ((0, 0), (0, v_pad - vocab_size)))
    out_b_pad = jnp.pad(out_b, ((0, 0), (0, v_pad - vocab_size)))

    return {
        "emb_table": jax.random.normal(k_emb, (vocab_size, attention_dim), jnp.float32),
        "pe": pe,
        "ln_gamma": jnp.ones((1, attention_dim), jnp.float32),
        "ln_beta": jnp.zeros((1, attention_dim), jnp.float32),
        "out_w": out_w,            # f32 master copy (used by the reference)
        "out_b": out_b,
        "out_w_bf16": out_w_bf16,  # kernel copy, pre-cast + pre-padded
        "out_b_pad": out_b_pad,
        "vocab_size": vocab_size,  # static ints (don't jit over the params dict)
        "vocab_tile": vocab_tile,
    }


# ---------------------------------------------------------------------------
# Pure-JAX reference (dtype-matched: bf16 matmul operands, f32 accumulation)
# ---------------------------------------------------------------------------

def _ref_forward(params, hs_pad, hlens, ys_in_pad, ys_in_lens):
    B, T = ys_in_pad.shape
    D = params["emb_table"].shape[1]
    x = params["emb_table"][ys_in_pad] * math.sqrt(D) + params["pe"][None, :T]
    mean = x.mean(-1, keepdims=True)
    var = ((x - mean) ** 2).mean(-1, keepdims=True)
    y = (x - mean) * jax.lax.rsqrt(var + 1e-12)
    y = y * params["ln_gamma"] + params["ln_beta"]
    logits = jnp.einsum("btd,dv->btv",
                        y.astype(jnp.bfloat16),
                        params["out_w"].astype(jnp.bfloat16),
                        preferred_element_type=jnp.float32) + params["out_b"]
    tgt_mask = ((jnp.arange(T)[None, :] < ys_in_lens[:, None])[:, None, :]
                & (jnp.arange(T)[:, None] >= jnp.arange(T)[None, :])[None])
    olens = tgt_mask.astype(jnp.int32).sum(1)
    return logits, olens


if __name__ == "__main__":
    B, T_out, T_in = 2, 8, 16
    vocab_size, attention_dim = 64, 32

    key = jax.random.PRNGKey(0)
    k_params, k_hs, k_tgt = jax.random.split(key, 3)

    params = make_params(k_params, vocab_size, attention_dim, max_len=T_out)

    hs_pad = jax.random.normal(k_hs, (B, T_in, attention_dim), jnp.float32)
    hlens = jnp.array([T_in, 10], jnp.int32)
    ys_in_pad = jax.random.randint(k_tgt, (B, T_out), 0, vocab_size, jnp.int32)
    ys_in_lens = jnp.array([T_out, 5], jnp.int32)

    logits, olens = base_decoder_forward(params, hs_pad, hlens, ys_in_pad, ys_in_lens)
    jax.block_until_ready((logits, olens))

    ref_logits, ref_olens = _ref_forward(params, hs_pad, hlens, ys_in_pad, ys_in_lens)
    assert logits.shape == (B, T_out, vocab_size) and olens.shape == (B, T_out)
    # bf16 weight/activation stream + f32 accumulation: compare to dtype-matched ref.
    assert jnp.allclose(logits, ref_logits, rtol=1e-2, atol=1e-2)
    assert jnp.array_equal(olens, ref_olens)

    print("KERNEL_OK")
</pallas_src>

<mosaic_0001>
module attributes {stable_mosaic.version = 11 : i64} {
  func.func @_proj_kernel_resident(%arg0: i32, %arg1: i32, %arg2: memref<16x32xbf16, #tpu.memory_space<vmem>>, %arg3: memref<32x256xbf16, #tpu.memory_space<vmem>>, %arg4: memref<1x256xf32, #tpu.memory_space<vmem>>, %arg5: memref<16x256xf32, #tpu.memory_space<vmem>>) attributes {dimension_semantics = [#tpu.dimension_semantics<parallel>, #tpu.dimension_semantics<parallel>], iteration_bounds = array<i64: 1, 1>, scalar_prefetch = 0 : i64, scratch_operands = 0 : i64, tpu.core_type = #tpu.core_type<tc>, window_params = [{pipeline_mode = #tpu.pipeline_mode<synchronous>, transform_indices = @transform_0, window_bounds = array<i64: 16, 32>}, {transform_indices = @transform_1, window_bounds = array<i64: 32, 256>}, {transform_indices = @transform_2, window_bounds = array<i64: 1, 256>}, {transform_indices = @transform_3, window_bounds = array<i64: 16, 256>}]} {
    %c16_i32 = arith.constant 16 : i32
    %0 = arith.muli %arg1, %c16_i32 : i32
    %1 = tpu.assume_multiple %0, 16 : i32
    %2 = arith.index_cast %1 : i32 to index
    %c0 = arith.constant 0 : index
    %3 = vector.load %arg2[%2, %c0] : memref<16x32xbf16, #tpu.memory_space<vmem>>, vector<16x32xbf16>
    %c0_0 = arith.constant 0 : index
    %c0_1 = arith.constant 0 : index
    %4 = vector.load %arg3[%c0_0, %c0_1] : memref<32x256xbf16, #tpu.memory_space<vmem>>, vector<32x256xbf16>
    %cst = arith.constant dense<0.000000e+00> : vector<16x256xf32>
    %5 = tpu.matmul %3, %4, %cst {dimension_numbers = #tpu.dot_dimension_numbers<[1], [0], [0], [1], [0, 0, 1, 1], [], []>} : vector<16x32xbf16>, vector<32x256xbf16>, vector<16x256xf32> -> vector<16x256xf32>
    %c0_2 = arith.constant 0 : index
    %c0_3 = arith.constant 0 : index
    %6 = vector.load %arg4[%c0_2, %c0_3] : memref<1x256xf32, #tpu.memory_space<vmem>>, vector<1x256xf32>
    %7 = vector.broadcast %6 : vector<1x256xf32> to vector<16x256xf32>
    %8 = arith.addf %5, %7 : vector<16x256xf32>
    %c0_4 = arith.constant 0 : index
    %c0_5 = arith.constant 0 : index
    %9 = vector.load %arg5[%c0_4, %c0_5] : memref<16x256xf32, #tpu.memory_space<vmem>>, vector<16x256xf32>
    tpu.vector_store %arg5[%c0_4, %c0_5], %8 {strides = array<i32>} : memref<16x256xf32, #tpu.memory_space<vmem>>, vector<16x256xf32>,
    return
  }
  func.func @transform_0(%arg0: i32, %arg1: i32) -> (i32, i32) {
    %c0_i32 = arith.constant 0 : i32
    %c0_i32_0 = arith.constant 0 : i32
    %c0_i32_1 = arith.constant 0 : i32
    return %c0_i32, %c0_i32_0 : i32, i32
  }
  func.func @transform_1(%arg0: i32, %arg1: i32) -> (i32, i32) {
    %c0_i32 = arith.constant 0 : i32
    %c0_i32_0 = arith.constant 0 : i32
    return %c0_i32, %arg0 : i32, i32
  }
  func.func @transform_2(%arg0: i32, %arg1: i32) -> (i32, i32) {
    %c0_i32 = arith.constant 0 : i32
    %c0_i32_0 = arith.constant 0 : i32
    return %c0_i32, %arg0 : i32, i32
  }
  func.func @transform_3(%arg0: i32, %arg1: i32) -> (i32, i32) {
    %c0_i32 = arith.constant 0 : i32
    return %arg1, %arg0 : i32, i32
  }
}

</mosaic_0001>

<bundles_post_ra>
// kernel: tpu_custom_call.1
= control target key start
LH: loop header
LB: loop body
LE: loop exit
PB: predicated region body
PF: predicated region fallthrough
CT: control target
= control target key end

     0   :  { %8 = vsyncpa [#allocation3], 0  ;;  %s342_s0 = inlined_call_operand.hbm [shape: bf16[16,32], index: 0, kind: input, shape index: {}]   ;;  %s343_s1 = inlined_call_operand.hbm [shape: bf16[32,256], index: 1, kind: input, shape index: {}]   ;;  %s344_s2 = inlined_call_operand.hbm [shape: f32[1,256], index: 2, kind: input, shape index: {}]   ;;  %s345_s3 = inlined_call_operand.hbm [shape: f32[16,256], index: 3, kind: output, shape index: {}]  }
   0x1   :  { %9 = vsyncpa [#allocation6], 0  ;;  %s28_s14 = sshll.u32 %s343_s1, 4  ;;  %s29_s14 = int_to_ptr.hbm [resolvable:$true] %s28_s14 }
   0x2   :  { %10 = vsyncpa [#allocation4], 0  ;;  %s300_s15 = smov [#allocation5]   ;;  %s15_s19 = sshll.u32 %s342_s0, 4  ;;  %s16_s19 = int_to_ptr.hbm [resolvable:$true] %s15_s19 }
   0x3   :  { %s30_s16 = sshll.u32 %s300_s15, 4  ;;  %s301_s20 = smov 128   ;;  %s31_s16 = int_to_ptr.vmem [resolvable:$true] %s30_s16 }
   0x4   :  { %s302_s21 = smov 8   ;;  %s303_s22 = smov [#allocation2]  }
   0x5   :  { %36 = dma.hbm_to_vmem [thread:$0]  %s29_s14, 512, %s31_s16, [#allocation6], %s301_s20, %s301_s20, %s302_s21  }
   0x6   :  { %s17_s23 = sshll.u32 %s303_s22, 4  ;;  %s304_s24 = smov 64   ;;  %s18_s23 = int_to_ptr.vmem [resolvable:$true] %s17_s23 }
   0x7   :  { %s305_s25 = smov 4   ;;  %s42_s27 = sshll.u32 %s344_s2, 4  ;;  %s43_s27 = int_to_ptr.hbm [resolvable:$true] %s42_s27 }
   0x8   :  { %23 = dma.hbm_to_vmem [thread:$0]  %s16_s19, 128, %s18_s23, [#allocation3], %s304_s24, %s304_s24, %s305_s25  }
   0x9   :  { %s306_s28 = smov [#allocation7]  }
   0xa   :  { %s44_s29 = sshll.u32 %s306_s28, 4  ;;  %s45_s29 = int_to_ptr.vmem [resolvable:$true] %s44_s29 }
   0xb   :  { %47 = dma.hbm_to_vmem [thread:$0]  %s43_s27, 32, %s45_s29, [#allocation6]  }
   0xc   :  { %294 = dma.done.wait [#allocation3], 128  }
   0xd   :  { %295 = vsyncadd [#allocation3], 4294967168 }
   0xe   :  { %296 = dma.done.wait [#allocation6], 544  }
   0xf   :  { %297 = vsyncadd [#allocation6], 4294966752  ;;  %v175_v0 = vld [vmem:[#allocation5 + $0x10] sm:$0xf]  ;;  %v187_v1 = vld [vmem:[#allocation5 + $0x14] sm:$0xf0] }
  0x10   :  { %v186_v2 = vld [vmem:[#allocation5 + $0x14] sm:$0xf]  ;;  %v176_v3 = vor.u32 %v187_v1, %v175_v0  ;;  %v177_v4 = vld [vmem:[#allocation5 + $0x18] sm:$0xf0]  ;;  %v167_v5 = vld [vmem:[#allocation5] sm:$0xf] }
  0x11   :  { %v185_v6 = vld [vmem:[#allocation5 + $0x4] sm:$0xf0]  ;;  %v180_v7 = vor.u32 %v186_v2, %v177_v4  ;;  %v184_v8 = vld [vmem:[#allocation5 + $0x4] sm:$0xf]  ;;  %v169_v9 = vld [vmem:[#allocation5 + $0x8] sm:$0xf0] }
  0x12   :  { %113 = vmatpush.bf16.msra.mxu0 %v176_v3  ;;  %v168_v10 = vor.u32 %v185_v6, %v167_v5  ;;  %v172_v11 = vor.u32 %v184_v8, %v169_v9  ;;  %v183_v12 = vld [vmem:[#allocation2] sm:$0xff]  ;;  %vm103_vm0 = vcmask 261120   ;;  %v72_v13 = vld [vmem:[#allocation7] sm:$0x3]  ;;  %s307_s0 = smov [#allocation8]   ;;  %s145_s5 = sshll.u32 %s345_s3, 4  ;;  %s146_s5 = int_to_ptr.hbm [resolvable:$true] %s145_s5 }
  0x13   :  { %127 = vmatpush.bf16.msra.mxu1 %v180_v7  ;;  %v74_v14 = vperm.slane %v72_v13, 0  ;;  %v75_v15 = vperm.slane %v72_v13, 1  ;;  %s143_s2 = sshll.u32 %s307_s0, 4  ;;  %s308_s6 = smov 256   ;;  %s144_s2 = int_to_ptr.vmem [resolvable:$true] %s143_s2 }
  0x14   :  { %s309_s7 = smov 16  }
  0x16   :  { %114 = vmatpush.bf16.msra.mxu0 %v168_v10 }
  0x17   :  { %128 = vmatpush.bf16.msra.mxu1 %v172_v11 }
  0x19   :  { %181 = vmatmul.msk.bf16.vlgmr.msra.gmra.mxu0 %vm103_vm0, %v183_v12 }
  0x1a   :  { %182 = vmatmul.msk.bf16.vlgmr.msra.gmra.mxu1 %vm103_vm0, %v183_v12 }
  0x96   :  { %v116_v16 = vpop.f32.mrf.mxu0 }
  0x97   :  { %v117_v17 = vadd.f32 %v116_v16, %v74_v14  ;;  %v130_v18 = vpop.f32.mrf.mxu1 }
  0x98   :  { %v131_v19 = vadd.f32 %v130_v18, %v75_v15 }
  0x99   :  { %135 = vst [vmem:[#allocation8] sm:$0xff] %v117_v17 }
  0x9a   :  { %136 = vst [vmem:[#allocation8 + $0x8] sm:$0xff] %v131_v19 }
  0x9e   :  { %v118_v20 = vpop.f32.mrf.mxu0 }
  0x9f   :  { %v119_v21 = vadd.f32 %v118_v20, %v74_v14  ;;  %v132_v22 = vpop.f32.mrf.mxu1 }
  0xa0   :  { %v133_v23 = vadd.f32 %v132_v22, %v75_v15 }
  0xa1   :  { %137 = vst [vmem:[#allocation8 + $0x10] sm:$0xff] %v119_v21 }
  0xa2   :  { %138 = vst [vmem:[#allocation8 + $0x18] sm:$0xff] %v133_v23 }
  0xa3   :  { %151 = dma.vmem_to_hbm [thread:$0]  %s144_s2, 512, %s146_s5, [#allocation4], %s308_s6, %s308_s6, %s309_s7  }
  0xa4   :  { %298 = dma.done.wait [#allocation4], 512  }
  0xa5   :  { %299 = vsyncadd [#allocation4], 4294966784 }
  0xa6   :  { %156 = vsyncpa [#allocation3], 1 }
  0xa7   :  { %157 = vsyncpa [#allocation6], 1 }
  0xa8   :  { %158 = vsyncpa [#allocation4], 1 }

</bundles_post_ra>
